<compile_context>
chip_gen: v7x
topology: tpu7x:2x2x1
jax: 0.10.0
libtpu: 0.0.40
codegen_flags: <defaults>
</compile_context>

<pallas_src>
import functools

import jax
import jax.numpy as jnp
from jax.experimental import pallas as pl
from jax.experimental.pallas import tpu as pltpu

_LANE = 128
_ROW_Q = 16  # bf16 packs 16 rows per vreg tile


def _round_up(n, m):
    return (n + m - 1) // m * m


def _cdiv(a, b):
    return (a + b - 1) // b


def _device_kind():
    try:
        return jax.devices()[0].device_kind.lower()
    except Exception:
        return ""


# --------------------------------------------------------------------------
# Kernel: one batch tile through the whole fused MLP (6 matmuls on the MXU).
# --------------------------------------------------------------------------
def _mlp_kernel(
    x_ref,
    w0_ref, b0_ref,
    w1a_ref, b1a_ref,
    w1b_ref, b1b_ref,
    w2a_ref, b2a_ref,
    w2b_ref, b2b_ref,
    w3_ref, b3_ref,
    o_ref,
    *,
    carry_dtype,
):
    f32 = jnp.float32
    bf16 = jnp.bfloat16

    def mm(act, w_ref, b_ref):
        # bf16 MXU inputs, f32 accumulation, f32 bias add.
        return jnp.dot(act.astype(bf16), w_ref[...],
                       preferred_element_type=f32) + b_ref[...]

    def act(v):
        # Fused ReLU + single cast to the carry dtype (bf16 on v6e/v7x,
        # f32 on v5e which has no bf16 VALU).
        return jnp.maximum(v, 0.0).astype(carry_dtype)

    x = x_ref[...]                                   # (TILE_B, IN_P) bf16

    # fc0 + relu0
    h = act(mm(x, w0_ref, b0_ref))

    # block1 (BN folded into the Linears, Dropout = identity in eval)
    a = act(mm(h, w1a_ref, b1a_ref))
    b = act(mm(a, w1b_ref, b1b_ref))
    h1 = b + h                                       # residual: x1 += x

    # block2
    c = act(mm(h1, w2a_ref, b2a_ref))
    d = act(mm(c, w2b_ref, b2b_ref))
    h2 = d + h1                                      # residual: x2 += x1

    # fc3 — lane-dense (padded to 128) unmasked bf16 store
    o_ref[...] = mm(h2, w3_ref, b3_ref).astype(o_ref.dtype)


# --------------------------------------------------------------------------
# Wrapper
# --------------------------------------------------------------------------
def linear_forward(x, prep, *, tile_b=512, out_dtype=jnp.float32):
    """x: (batch, n_input) f32. prep: dict from prepare_params()."""
    n_in = prep["n_input"]
    n_out = prep["n_output"]
    n_in_p = prep["w0"].shape[0]
    n_out_p = prep["w3"].shape[1]

    kind = _device_kind()
    is_v5 = "v5" in kind
    is_v7 = "v7" in kind
    carry_dtype = jnp.float32 if is_v5 else jnp.bfloat16

    batch = x.shape[0]
    # Balanced tiling: 16-row quantum (bf16 sublane packing), no double
    # round-up of the batch.
    padded_b = _round_up(max(batch, _ROW_Q), _ROW_Q)
    num_tiles = _cdiv(padded_b, min(tile_b, padded_b))
    if is_v7 and padded_b >= 2 * _ROW_Q:
        # Ensure >=2 (even) grid steps so the parallel batch axis shards
        # across both v7x TensorCores.
        num_tiles = max(num_tiles, 2)
        if num_tiles % 2:
            num_tiles += 1
    tb = _round_up(_cdiv(padded_b, num_tiles), _ROW_Q)
    padded_b = num_tiles * tb

    # Zero-pad batch rows and feature lanes; cast input to bf16 (halves DMA).
    x_pad = jnp.zeros((padded_b, n_in_p), jnp.bfloat16)
    x_pad = x_pad.at[:batch, :n_in].set(x.astype(jnp.bfloat16))

    weight_args = (
        prep["w0"], prep["b0"],
        prep["w1a"], prep["b1a"],
        prep["w1b"], prep["b1b"],
        prep["w2a"], prep["b2a"],
        prep["w2b"], prep["b2b"],
        prep["w3"], prep["b3"],
    )

    def resident(shape):
        # Constant index_map -> fetched once, stays in VMEM across grid steps.
        return pl.BlockSpec(shape, lambda i: (0, 0))

    in_specs = [pl.BlockSpec((tb, n_in_p), lambda i: (i, 0))]
    in_specs += [resident(a.shape) for a in weight_args]
    out_spec = pl.BlockSpec((tb, n_out_p), lambda i: (i, 0))

    # Generation-aware scoped-VMEM budget: v7x has 64 MiB/TC, v5e/v6e 128 MiB.
    vmem_limit = (48 if is_v7 else 100) * 1024 * 1024

    y_pad = pl.pallas_call(
        functools.partial(_mlp_kernel, carry_dtype=carry_dtype),
        out_shape=jax.ShapeDtypeStruct((padded_b, n_out_p), jnp.bfloat16),
        grid=(num_tiles,),
        in_specs=in_specs,
        out_specs=out_spec,
        compiler_params=pltpu.CompilerParams(
            dimension_semantics=("parallel",),   # megacore sharding on v7x
            vmem_limit_bytes=vmem_limit,
        ),
    )(x_pad, *weight_args)

    # Slice off the padding; cast back to f32 only here (fuses with the slice).
    return y_pad[:batch, :n_out].astype(out_dtype)


# --------------------------------------------------------------------------
# Parameter construction (torch-equivalent init) and prep (fold + pad + bf16)
# --------------------------------------------------------------------------
def _init_linear(key, fan_in, fan_out):
    """torch nn.Linear default init: U(-1/sqrt(fan_in), 1/sqrt(fan_in))."""
    kw, kb = jax.random.split(key)
    bound = 1.0 / jnp.sqrt(jnp.float32(fan_in))
    w = jax.random.uniform(kw, (fan_in, fan_out), jnp.float32, -bound, bound)
    b = jax.random.uniform(kb, (1, fan_out), jnp.float32, -bound, bound)
    return w, b


def _init_bn(key, n, eps=1e-5):
    """BatchNorm1d eval mode folded to per-feature scale/shift."""
    k1, k2, k3 = jax.random.split(key, 3)
    gamma = 1.0 + 0.1 * jax.random.normal(k1, (1, n), jnp.float32)
    beta = 0.1 * jax.random.normal(k2, (1, n), jnp.float32)
    running_mean = 0.1 * jax.random.normal(k3, (1, n), jnp.float32)
    running_var = jnp.ones((1, n), jnp.float32)
    scale = gamma * jax.lax.rsqrt(running_var + eps)
    shift = beta - running_mean * scale
    return scale, shift


def init_params(key, n_input, n_hidden, n_output):
    ks = jax.random.split(key, 10)
    p = {}
    p["w0"], p["b0"] = _init_linear(ks[0], n_input, n_hidden)
    p["w1a"], p["b1a"] = _init_linear(ks[1], n_hidden, n_hidden)
    p["s1a"], p["t1a"] = _init_bn(ks[2], n_hidden)
    p["w1b"], p["b1b"] = _init_linear(ks[3], n_hidden, n_hidden)
    p["s1b"], p["t1b"] = _init_bn(ks[4], n_hidden)
    p["w2a"], p["b2a"] = _init_linear(ks[5], n_hidden, n_hidden)
    p["s2a"], p["t2a"] = _init_bn(ks[6], n_hidden)
    p["w2b"], p["b2b"] = _init_linear(ks[7], n_hidden, n_hidden)
    p["s2b"], p["t2b"] = _init_bn(ks[8], n_hidden)
    p["w3"], p["b3"] = _init_linear(ks[9], n_hidden, n_output)
    return p


def prepare_params(raw):
    """Fold eval-mode BN into the preceding Linear, pad to 128-multiples,
    cast weights to bf16 (biases stay f32 for the f32 accumulator add)."""

    def fold(w, b, scale, shift):
        if scale is not None:
            w = w * scale                  # (in,out) * (1,out)
            b = b * scale + shift
        return w, b

    def pad_w(w):
        i, o = w.shape
        out = jnp.zeros((_round_up(i, _LANE), _round_up(o, _LANE)), jnp.float32)
        return out.at[:i, :o].set(w).astype(jnp.bfloat16)

    def pad_b(b):
        o = b.shape[1]
        return jnp.zeros((1, _round_up(o, _LANE)), jnp.float32).at[:, :o].set(b)

    layers = [
        ("w0", "b0", None, None),
        ("w1a", "b1a", "s1a", "t1a"),
        ("w1b", "b1b", "s1b", "t1b"),
        ("w2a", "b2a", "s2a", "t2a"),
        ("w2b", "b2b", "s2b", "t2b"),
        ("w3", "b3", None, None),
    ]
    prep = {}
    for wk, bk, sk, tk in layers:
        w, b = fold(raw[wk], raw[bk],
                    raw[sk] if sk else None,
                    raw[tk] if tk else None)
        prep[wk] = pad_w(w)
        prep[bk] = pad_b(b)
    prep["n_input"] = raw["w0"].shape[0]
    prep["n_output"] = raw["w3"].shape[1]
    return prep


def _reference_forward(x, prep, *, out_dtype=jnp.float32):
    """Pure-JAX reference of the same eval-mode forward, mirroring the
    kernel's numerics (bf16 MXU inputs, f32 accumulation, same carry dtype,
    bf16 output)."""
    kind = _device_kind()
    carry_dtype = jnp.float32 if "v5" in kind else jnp.bfloat16
    bf16 = jnp.bfloat16

    def dot(a, w):
        return jnp.dot(a.astype(bf16), w, preferred_element_type=jnp.float32)

    def act(v):
        return jnp.maximum(v, 0.0).astype(carry_dtype)

    n_in, n_out = prep["n_input"], prep["n_output"]
    xin = jnp.zeros((x.shape[0], prep["w0"].shape[0]), bf16)
    xin = xin.at[:, :n_in].set(x.astype(bf16))

    h = act(dot(xin, prep["w0"]) + prep["b0"])
    a = act(dot(h, prep["w1a"]) + prep["b1a"])
    b = act(dot(a, prep["w1b"]) + prep["b1b"])
    h1 = b + h
    c = act(dot(h1, prep["w2a"]) + prep["b2a"])
    d = act(dot(c, prep["w2b"]) + prep["b2b"])
    h2 = d + h1
    y = (dot(h2, prep["w3"]) + prep["b3"]).astype(bf16)
    return y[:, :n_out].astype(out_dtype)


if __name__ == "__main__":
    batch, n_input, n_hidden, n_output = 8, 16, 32, 8

    key = jax.random.PRNGKey(0)
    kx, kp = jax.random.split(key)
    x = jax.random.normal(kx, (batch, n_input), jnp.float32)

    raw = init_params(kp, n_input, n_hidden, n_output)
    prep = prepare_params(raw)

    y = linear_forward(x, prep)
    y = jax.block_until_ready(y)

    y_ref = _reference_forward(x, prep)
    assert y.shape == (batch, n_output)
    assert jnp.allclose(y, y_ref, atol=2e-2, rtol=2e-2), "mismatch vs reference"

    print("KERNEL_OK")
</pallas_src>

<mosaic_0001>
module attributes {stable_mosaic.version = 11 : i64} {
  func.func @_mlp_kernel(%arg0: i32, %arg1: memref<16x128xbf16, #tpu.memory_space<vmem>>, %arg2: memref<128x128xbf16, #tpu.memory_space<vmem>>, %arg3: memref<1x128xf32, #tpu.memory_space<vmem>>, %arg4: memref<128x128xbf16, #tpu.memory_space<vmem>>, %arg5: memref<1x128xf32, #tpu.memory_space<vmem>>, %arg6: memref<128x128xbf16, #tpu.memory_space<vmem>>, %arg7: memref<1x128xf32, #tpu.memory_space<vmem>>, %arg8: memref<128x128xbf16, #tpu.memory_space<vmem>>, %arg9: memref<1x128xf32, #tpu.memory_space<vmem>>, %arg10: memref<128x128xbf16, #tpu.memory_space<vmem>>, %arg11: memref<1x128xf32, #tpu.memory_space<vmem>>, %arg12: memref<128x128xbf16, #tpu.memory_space<vmem>>, %arg13: memref<1x128xf32, #tpu.memory_space<vmem>>, %arg14: memref<16x128xbf16, #tpu.memory_space<vmem>>) attributes {dimension_semantics = [#tpu.dimension_semantics<parallel>], iteration_bounds = array<i64: 1>, scalar_prefetch = 0 : i64, scratch_operands = 0 : i64, tpu.core_type = #tpu.core_type<tc>, window_params = [{transform_indices = @transform_0, window_bounds = array<i64: 16, 128>}, {pipeline_mode = #tpu.pipeline_mode<synchronous>, transform_indices = @transform_1, window_bounds = array<i64: 128, 128>}, {pipeline_mode = #tpu.pipeline_mode<synchronous>, transform_indices = @transform_2, window_bounds = array<i64: 1, 128>}, {pipeline_mode = #tpu.pipeline_mode<synchronous>, transform_indices = @transform_3, window_bounds = array<i64: 128, 128>}, {pipeline_mode = #tpu.pipeline_mode<synchronous>, transform_indices = @transform_4, window_bounds = array<i64: 1, 128>}, {pipeline_mode = #tpu.pipeline_mode<synchronous>, transform_indices = @transform_5, window_bounds = array<i64: 128, 128>}, {pipeline_mode = #tpu.pipeline_mode<synchronous>, transform_indices = @transform_6, window_bounds = array<i64: 1, 128>}, {pipeline_mode = #tpu.pipeline_mode<synchronous>, transform_indices = @transform_7, window_bounds = array<i64: 128, 128>}, {pipeline_mode = #tpu.pipeline_mode<synchronous>, transform_indices = @transform_8, window_bounds = array<i64: 1, 128>}, {pipeline_mode = #tpu.pipeline_mode<synchronous>, transform_indices = @transform_9, window_bounds = array<i64: 128, 128>}, {pipeline_mode = #tpu.pipeline_mode<synchronous>, transform_indices = @transform_10, window_bounds = array<i64: 1, 128>}, {pipeline_mode = #tpu.pipeline_mode<synchronous>, transform_indices = @transform_11, window_bounds = array<i64: 128, 128>}, {pipeline_mode = #tpu.pipeline_mode<synchronous>, transform_indices = @transform_12, window_bounds = array<i64: 1, 128>}, {transform_indices = @transform_13, window_bounds = array<i64: 16, 128>}]} {
    %c0 = arith.constant 0 : index
    %c0_0 = arith.constant 0 : index
    %0 = vector.load %arg1[%c0, %c0_0] : memref<16x128xbf16, #tpu.memory_space<vmem>>, vector<16x128xbf16>
    %c0_1 = arith.constant 0 : index
    %c0_2 = arith.constant 0 : index
    %1 = vector.load %arg2[%c0_1, %c0_2] : memref<128x128xbf16, #tpu.memory_space<vmem>>, vector<128x128xbf16>
    %cst = arith.constant dense<0.000000e+00> : vector<16x128xf32>
    %2 = tpu.matmul %0, %1, %cst {dimension_numbers = #tpu.dot_dimension_numbers<[1], [0], [0], [1], [0, 0, 1, 1], [], []>} : vector<16x128xbf16>, vector<128x128xbf16>, vector<16x128xf32> -> vector<16x128xf32>
    %c0_3 = arith.constant 0 : index
    %c0_4 = arith.constant 0 : index
    %3 = vector.load %arg3[%c0_3, %c0_4] : memref<1x128xf32, #tpu.memory_space<vmem>>, vector<1x128xf32>
    %4 = vector.broadcast %3 : vector<1x128xf32> to vector<16x128xf32>
    %5 = arith.addf %2, %4 : vector<16x128xf32>
    %cst_5 = arith.constant 0.000000e+00 : f32
    %6 = vector.broadcast %cst_5 : f32 to vector<16x128xf32>
    %7 = arith.maximumf %5, %6 : vector<16x128xf32>
    %8 = arith.truncf %7 : vector<16x128xf32> to vector<16x128xbf16>
    %c0_6 = arith.constant 0 : index
    %c0_7 = arith.constant 0 : index
    %9 = vector.load %arg4[%c0_6, %c0_7] : memref<128x128xbf16, #tpu.memory_space<vmem>>, vector<128x128xbf16>
    %cst_8 = arith.constant dense<0.000000e+00> : vector<16x128xf32>
    %10 = tpu.matmul %8, %9, %cst_8 {dimension_numbers = #tpu.dot_dimension_numbers<[1], [0], [0], [1], [0, 0, 1, 1], [], []>} : vector<16x128xbf16>, vector<128x128xbf16>, vector<16x128xf32> -> vector<16x128xf32>
    %c0_9 = arith.constant 0 : index
    %c0_10 = arith.constant 0 : index
    %11 = vector.load %arg5[%c0_9, %c0_10] : memref<1x128xf32, #tpu.memory_space<vmem>>, vector<1x128xf32>
    %12 = vector.broadcast %11 : vector<1x128xf32> to vector<16x128xf32>
    %13 = arith.addf %10, %12 : vector<16x128xf32>
    %cst_11 = arith.constant 0.000000e+00 : f32
    %14 = vector.broadcast %cst_11 : f32 to vector<16x128xf32>
    %15 = arith.maximumf %13, %14 : vector<16x128xf32>
    %16 = arith.truncf %15 : vector<16x128xf32> to vector<16x128xbf16>
    %c0_12 = arith.constant 0 : index
    %c0_13 = arith.constant 0 : index
    %17 = vector.load %arg6[%c0_12, %c0_13] : memref<128x128xbf16, #tpu.memory_space<vmem>>, vector<128x128xbf16>
    %cst_14 = arith.constant dense<0.000000e+00> : vector<16x128xf32>
    %18 = tpu.matmul %16, %17, %cst_14 {dimension_numbers = #tpu.dot_dimension_numbers<[1], [0], [0], [1], [0, 0, 1, 1], [], []>} : vector<16x128xbf16>, vector<128x128xbf16>, vector<16x128xf32> -> vector<16x128xf32>
    %c0_15 = arith.constant 0 : index
    %c0_16 = arith.constant 0 : index
    %19 = vector.load %arg7[%c0_15, %c0_16] : memref<1x128xf32, #tpu.memory_space<vmem>>, vector<1x128xf32>
    %20 = vector.broadcast %19 : vector<1x128xf32> to vector<16x128xf32>
    %21 = arith.addf %18, %20 : vector<16x128xf32>
    %cst_17 = arith.constant 0.000000e+00 : f32
    %22 = vector.broadcast %cst_17 : f32 to vector<16x128xf32>
    %23 = arith.maximumf %21, %22 : vector<16x128xf32>
    %24 = arith.truncf %23 : vector<16x128xf32> to vector<16x128xbf16>
    %25 = arith.addf %24, %8 : vector<16x128xbf16>
    %c0_18 = arith.constant 0 : index
    %c0_19 = arith.constant 0 : index
    %26 = vector.load %arg8[%c0_18, %c0_19] : memref<128x128xbf16, #tpu.memory_space<vmem>>, vector<128x128xbf16>
    %cst_20 = arith.constant dense<0.000000e+00> : vector<16x128xf32>
    %27 = tpu.matmul %25, %26, %cst_20 {dimension_numbers = #tpu.dot_dimension_numbers<[1], [0], [0], [1], [0, 0, 1, 1], [], []>} : vector<16x128xbf16>, vector<128x128xbf16>, vector<16x128xf32> -> vector<16x128xf32>
    %c0_21 = arith.constant 0 : index
    %c0_22 = arith.constant 0 : index
    %28 = vector.load %arg9[%c0_21, %c0_22] : memref<1x128xf32, #tpu.memory_space<vmem>>, vector<1x128xf32>
    %29 = vector.broadcast %28 : vector<1x128xf32> to vector<16x128xf32>
    %30 = arith.addf %27, %29 : vector<16x128xf32>
    %cst_23 = arith.constant 0.000000e+00 : f32
    %31 = vector.broadcast %cst_23 : f32 to vector<16x128xf32>
    %32 = arith.maximumf %30, %31 : vector<16x128xf32>
    %33 = arith.truncf %32 : vector<16x128xf32> to vector<16x128xbf16>
    %c0_24 = arith.constant 0 : index
    %c0_25 = arith.constant 0 : index
    %34 = vector.load %arg10[%c0_24, %c0_25] : memref<128x128xbf16, #tpu.memory_space<vmem>>, vector<128x128xbf16>
    %cst_26 = arith.constant dense<0.000000e+00> : vector<16x128xf32>
    %35 = tpu.matmul %33, %34, %cst_26 {dimension_numbers = #tpu.dot_dimension_numbers<[1], [0], [0], [1], [0, 0, 1, 1], [], []>} : vector<16x128xbf16>, vector<128x128xbf16>, vector<16x128xf32> -> vector<16x128xf32>
    %c0_27 = arith.constant 0 : index
    %c0_28 = arith.constant 0 : index
    %36 = vector.load %arg11[%c0_27, %c0_28] : memref<1x128xf32, #tpu.memory_space<vmem>>, vector<1x128xf32>
    %37 = vector.broadcast %36 : vector<1x128xf32> to vector<16x128xf32>
    %38 = arith.addf %35, %37 : vector<16x128xf32>
    %cst_29 = arith.constant 0.000000e+00 : f32
    %39 = vector.broadcast %cst_29 : f32 to vector<16x128xf32>
    %40 = arith.maximumf %38, %39 : vector<16x128xf32>
    %41 = arith.truncf %40 : vector<16x128xf32> to vector<16x128xbf16>
    %42 = arith.addf %41, %25 : vector<16x128xbf16>
    %c0_30 = arith.constant 0 : index
    %c0_31 = arith.constant 0 : index
    %43 = vector.load %arg12[%c0_30, %c0_31] : memref<128x128xbf16, #tpu.memory_space<vmem>>, vector<128x128xbf16>
    %cst_32 = arith.constant dense<0.000000e+00> : vector<16x128xf32>
    %44 = tpu.matmul %42, %43, %cst_32 {dimension_numbers = #tpu.dot_dimension_numbers<[1], [0], [0], [1], [0, 0, 1, 1], [], []>} : vector<16x128xbf16>, vector<128x128xbf16>, vector<16x128xf32> -> vector<16x128xf32>
    %c0_33 = arith.constant 0 : index
    %c0_34 = arith.constant 0 : index
    %45 = vector.load %arg13[%c0_33, %c0_34] : memref<1x128xf32, #tpu.memory_space<vmem>>, vector<1x128xf32>
    %46 = vector.broadcast %45 : vector<1x128xf32> to vector<16x128xf32>
    %47 = arith.addf %44, %46 : vector<16x128xf32>
    %48 = arith.truncf %47 : vector<16x128xf32> to vector<16x128xbf16>
    %c0_35 = arith.constant 0 : index
    %c0_36 = arith.constant 0 : index
    %49 = vector.load %arg14[%c0_35, %c0_36] : memref<16x128xbf16, #tpu.memory_space<vmem>>, vector<16x128xbf16>
    tpu.vector_store %arg14[%c0_35, %c0_36], %48 {strides = array<i32>} : memref<16x128xbf16, #tpu.memory_space<vmem>>, vector<16x128xbf16>,
    return
  }
  func.func @transform_0(%arg0: i32) -> (i32, i32) {
    %c0_i32 = arith.constant 0 : i32
    %c0_i32_0 = arith.constant 0 : i32
    return %arg0, %c0_i32 : i32, i32
  }
  func.func @transform_1(%arg0: i32) -> (i32, i32) {
    %c0_i32 = arith.constant 0 : i32
    %c0_i32_0 = arith.constant 0 : i32
    %c0_i32_1 = arith.constant 0 : i32
    return %c0_i32, %c0_i32_0 : i32, i32
  }
  func.func @transform_2(%arg0: i32) -> (i32, i32) {
    %c0_i32 = arith.constant 0 : i32
    %c0_i32_0 = arith.constant 0 : i32
    %c0_i32_1 = arith.constant 0 : i32
    return %c0_i32, %c0_i32_0 : i32, i32
  }
  func.func @transform_3(%arg0: i32) -> (i32, i32) {
    %c0_i32 = arith.constant 0 : i32
    %c0_i32_0 = arith.constant 0 : i32
    %c0_i32_1 = arith.constant 0 : i32
    return %c0_i32, %c0_i32_0 : i32, i32
  }
  func.func @transform_4(%arg0: i32) -> (i32, i32) {
    %c0_i32 = arith.constant 0 : i32
    %c0_i32_0 = arith.constant 0 : i32
    %c0_i32_1 = arith.constant 0 : i32
    return %c0_i32, %c0_i32_0 : i32, i32
  }
  func.func @transform_5(%arg0: i32) -> (i32, i32) {
    %c0_i32 = arith.constant 0 : i32
    %c0_i32_0 = arith.constant 0 : i32
    %c0_i32_1 = arith.constant 0 : i32
    return %c0_i32, %c0_i32_0 : i32, i32
  }
  func.func @transform_6(%arg0: i32) -> (i32, i32) {
    %c0_i32 = arith.constant 0 : i32
    %c0_i32_0 = arith.constant 0 : i32
    %c0_i32_1 = arith.constant 0 : i32
    return %c0_i32, %c0_i32_0 : i32, i32
  }
  func.func @transform_7(%arg0: i32) -> (i32, i32) {
    %c0_i32 = arith.constant 0 : i32
    %c0_i32_0 = arith.constant 0 : i32
    %c0_i32_1 = arith.constant 0 : i32
    return %c0_i32, %c0_i32_0 : i32, i32
  }
  func.func @transform_8(%arg0: i32) -> (i32, i32) {
    %c0_i32 = arith.constant 0 : i32
    %c0_i32_0 = arith.constant 0 : i32
    %c0_i32_1 = arith.constant 0 : i32
    return %c0_i32, %c0_i32_0 : i32, i32
  }
  func.func @transform_9(%arg0: i32) -> (i32, i32) {
    %c0_i32 = arith.constant 0 : i32
    %c0_i32_0 = arith.constant 0 : i32
    %c0_i32_1 = arith.constant 0 : i32
    return %c0_i32, %c0_i32_0 : i32, i32
  }
  func.func @transform_10(%arg0: i32) -> (i32, i32) {
    %c0_i32 = arith.constant 0 : i32
    %c0_i32_0 = arith.constant 0 : i32
    %c0_i32_1 = arith.constant 0 : i32
    return %c0_i32, %c0_i32_0 : i32, i32
  }
  func.func @transform_11(%arg0: i32) -> (i32, i32) {
    %c0_i32 = arith.constant 0 : i32
    %c0_i32_0 = arith.constant 0 : i32
    %c0_i32_1 = arith.constant 0 : i32
    return %c0_i32, %c0_i32_0 : i32, i32
  }
  func.func @transform_12(%arg0: i32) -> (i32, i32) {
    %c0_i32 = arith.constant 0 : i32
    %c0_i32_0 = arith.constant 0 : i32
    %c0_i32_1 = arith.constant 0 : i32
    return %c0_i32, %c0_i32_0 : i32, i32
  }
  func.func @transform_13(%arg0: i32) -> (i32, i32) {
    %c0_i32 = arith.constant 0 : i32
    %c0_i32_0 = arith.constant 0 : i32
    return %arg0, %c0_i32 : i32, i32
  }
}

</mosaic_0001>

<bundles_post_ra>
// kernel: tpu_custom_call.1
= control target key start
LH: loop header
LB: loop body
LE: loop exit
PB: predicated region body
PF: predicated region fallthrough
CT: control target
= control target key end

     0   :  { %18 = vsyncpa [#allocation3], 0  ;;  %s1934_s0 = inlined_call_operand.hbm [shape: bf16[16,128], index: 0, kind: input, shape index: {}]   ;;  %s1935_s1 = inlined_call_operand.hbm [shape: bf16[128,128], index: 1, kind: input, shape index: {}]   ;;  %s1936_s2 = inlined_call_operand.hbm [shape: f32[1,128], index: 2, kind: input, shape index: {}]   ;;  %s1937_s3 = inlined_call_operand.hbm [shape: bf16[128,128], index: 3, kind: input, shape index: {}]   ;;  %s1938_s4 = inlined_call_operand.hbm [shape: f32[1,128], index: 4, kind: input, shape index: {}]   ;;  %s1939_s5 = inlined_call_operand.hbm [shape: bf16[128,128], index: 5, kind: input, shape index: {}]   ;;  %s1940_s6 = inlined_call_operand.hbm [shape: f32[1,128], index: 6, kind: input, shape index: {}]   ;;  %s1941_s7 = inlined_call_operand.hbm [shape: bf16[128,128], index: 7, kind: input, shape index: {}]   ;;  %s1942_s8 = inlined_call_operand.hbm [shape: f32[1,128], index: 8, kind: input, shape index: {}]   ;;  %s1943_s9 = inlined_call_operand.hbm [shape: bf16[128,128], index: 9, kind: input, shape index: {}]   ;;  %s1944_s10 = inlined_call_operand.hbm [shape: f32[1,128], index: 10, kind: input, shape index: {}]   ;;  %s1945_s11 = inlined_call_operand.hbm [shape: bf16[128,128], index: 11, kind: input, shape index: {}]   ;;  %s1946_s12 = inlined_call_operand.hbm [shape: f32[1,128], index: 12, kind: input, shape index: {}]   ;;  %s1947_s13 = inlined_call_operand.hbm [shape: bf16[16,128], index: 13, kind: output, shape index: {}]  }
   0x1   :  { %19 = vsyncpa [#allocation6], 0 }
   0x2   :  { %20 = vsyncpa [#allocation9], 0 }
   0x3   :  { %21 = vsyncpa [#allocation12], 0 }
   0x4   :  { %22 = vsyncpa [#allocation15], 0 }
   0x5   :  { %23 = vsyncpa [#allocation18], 0 }
   0x6   :  { %24 = vsyncpa [#allocation21], 0 }
   0x7   :  { %25 = vsyncpa [#allocation4], 0  ;;  %s1569_s25 = smov [#allocation5]   ;;  %s1570_s27 = smov [#allocation8]  }
   0x8   :  { %s43_s26 = sshll.u32 %s1569_s25, 4  ;;  %s65_s28 = sshll.u32 %s1570_s27, 4  ;;  %s44_s26 = int_to_ptr.vmem [resolvable:$true] %s43_s26  ;;  %s1657_s28 = int_to_ptr.vmem [resolvable:$true] %s65_s28 }
   0x9   :  { %s1245_s14 = scalar_lea.hbm %s1935_s1, 1024 }
   0xa   :  { %p1246_p0 = scmp.ne.s32.totalorder %s1935_s1, %s1245_s14  ;;  %p1249_p1 = scmp.lt.u32.totalorder %s1245_s14, %s1935_s1 }
   0xc   :  { %p1251_p2 = pnand %p1249_p1, %p1246_p0 }
   0xe   :  { %1254 = shalt.err (!%p1251_p2)
}
   0xf   :  { %s1255_s19 = scalar_lea.vmem %s44_s26, 1024  ;;  %p1260_p4 = scmp.lt.s32.totalorder %s44_s26, %s44_s26 }
  0x10   :  { %p1256_p3 = scmp.ne.s32.totalorder %s44_s26, %s1255_s19  ;;  %p1261_p5 = scmp.lt.s32.totalorder %s1255_s19, %s1255_s19 }
  0x12   :  { %p1262_p6 = por %p1261_p5, %p1260_p4 }
  0x14   :  { %p1263_p7 = pnand %p1262_p6, %p1256_p3 }
  0x16   :  { %1266 = shalt.err (!%p1263_p7)
}
  0x17   :  { %s1571_s20 = smov 64   ;;  %s1572_s21 = smov 4  }
  0x18   :  { %49 = dma.hbm_to_vmem [thread:$0]  %s1935_s1, 1024, %s44_s26, [#allocation6], %s1571_s20, %s1571_s20, %s1572_s21  }
  0x19   :  { %s1267_s27 = scalar_lea.hbm %s1937_s3, 1024 }
  0x1a   :  { %p1268_p8 = scmp.ne.s32.totalorder %s1937_s3, %s1267_s27  ;;  %p1271_p9 = scmp.lt.u32.totalorder %s1267_s27, %s1937_s3 }
  0x1c   :  { %p1273_p10 = pnand %p1271_p9, %p1268_p8 }
  0x1e   :  { %1276 = shalt.err (!%p1273_p10)
}
  0x1f   :  { %s1277_s16 = scalar_lea.vmem %s1657_s28, 1024  ;;  %p1282_p12 = scmp.lt.s32.totalorder %s1657_s28, %s1657_s28 }
  0x20   :  { %p1278_p11 = scmp.ne.s32.totalorder %s1657_s28, %s1277_s16  ;;  %p1283_p13 = scmp.lt.s32.totalorder %s1277_s16, %s1277_s16 }
  0x22   :  { %p1284_p0 = por %p1283_p13, %p1282_p12 }
  0x24   :  { %p1285_p1 = pnand %p1284_p0, %p1278_p11 }
  0x26   :  { %1288 = shalt.err (!%p1285_p1)
}
  0x27   :  { %71 = dma.hbm_to_vmem [thread:$0]  %s1937_s3, 1024, %s1657_s28, [#allocation9], %s1571_s20, %s1571_s20, %s1572_s21  }
  0x28   :  { %s1573_s17 = smov [#allocation11]   ;;  %s1574_s19 = smov [#allocation14]  }
  0x29   :  { %s87_s18 = sshll.u32 %s1573_s17, 4  ;;  %s109_s22 = sshll.u32 %s1574_s19, 4  ;;  %s88_s18 = int_to_ptr.vmem [resolvable:$true] %s87_s18  ;;  %s1694_s22 = int_to_ptr.vmem [resolvable:$true] %s109_s22 }
  0x2a   :  { %s1289_s25 = scalar_lea.hbm %s1939_s5, 1024 }
  0x2b   :  { %p1290_p2 = scmp.ne.s32.totalorder %s1939_s5, %s1289_s25  ;;  %p1293_p3 = scmp.lt.u32.totalorder %s1289_s25, %s1939_s5 }
  0x2d   :  { %p1295_p4 = pnand %p1293_p3, %p1290_p2 }
  0x2f   :  { %1298 = shalt.err (!%p1295_p4)
}
  0x30   :  { %s1299_s3 = scalar_lea.vmem %s88_s18, 1024  ;;  %p1304_p6 = scmp.lt.s32.totalorder %s88_s18, %s88_s18 }
  0x31   :  { %p1300_p5 = scmp.ne.s32.totalorder %s88_s18, %s1299_s3  ;;  %p1305_p7 = scmp.lt.s32.totalorder %s1299_s3, %s1299_s3 }
  0x33   :  { %p1306_p8 = por %p1305_p7, %p1304_p6 }
  0x35   :  { %p1307_p9 = pnand %p1306_p8, %p1300_p5 }
  0x37   :  { %1310 = shalt.err (!%p1307_p9)
}
  0x38   :  { %93 = dma.hbm_to_vmem [thread:$0]  %s1939_s5, 1024, %s88_s18, [#allocation12], %s1571_s20, %s1571_s20, %s1572_s21  }
  0x39   :  { %s1311_s26 = scalar_lea.hbm %s1941_s7, 1024 }
  0x3a   :  { %p1312_p10 = scmp.ne.s32.totalorder %s1941_s7, %s1311_s26  ;;  %p1315_p11 = scmp.lt.u32.totalorder %s1311_s26, %s1941_s7 }
  0x3c   :  { %p1317_p12 = pnand %p1315_p11, %p1312_p10 }
  0x3e   :  { %1320 = shalt.err (!%p1317_p12)
}
  0x3f   :  { %s1321_s25 = scalar_lea.vmem %s1694_s22, 1024  ;;  %p1326_p0 = scmp.lt.s32.totalorder %s1694_s22, %s1694_s22 }
  0x40   :  { %p1322_p13 = scmp.ne.s32.totalorder %s1694_s22, %s1321_s25  ;;  %p1327_p1 = scmp.lt.s32.totalorder %s1321_s25, %s1321_s25 }
  0x42   :  { %p1328_p2 = por %p1327_p1, %p1326_p0 }
  0x44   :  { %p1329_p3 = pnand %p1328_p2, %p1322_p13 }
  0x46   :  { %1332 = shalt.err (!%p1329_p3)
}
  0x47   :  { %115 = dma.hbm_to_vmem [thread:$0]  %s1941_s7, 1024, %s1694_s22, [#allocation15], %s1571_s20, %s1571_s20, %s1572_s21  }
  0x48   :  { %s1575_s27 = smov [#allocation17]   ;;  %s1576_s30 = smov [#allocation20]  }
  0x49   :  { %s131_s29 = sshll.u32 %s1575_s27, 4  ;;  %s153_s14 = sshll.u32 %s1576_s30, 4  ;;  %s132_s29 = int_to_ptr.vmem [resolvable:$true] %s131_s29  ;;  %s1731_s14 = int_to_ptr.vmem [resolvable:$true] %s153_s14 }
  0x4a   :  { %s1333_s15 = scalar_lea.hbm %s1943_s9, 1024 }
  0x4b   :  { %p1334_p4 = scmp.ne.s32.totalorder %s1943_s9, %s1333_s15  ;;  %p1337_p5 = scmp.lt.u32.totalorder %s1333_s15, %s1943_s9 }
  0x4d   :  { %p1339_p6 = pnand %p1337_p5, %p1334_p4 }
  0x4f   :  { %1342 = shalt.err (!%p1339_p6)
}
  0x50   :  { %s1343_s7 = scalar_lea.vmem %s132_s29, 1024  ;;  %p1348_p8 = scmp.lt.s32.totalorder %s132_s29, %s132_s29 }
  0x51   :  { %p1344_p7 = scmp.ne.s32.totalorder %s132_s29, %s1343_s7  ;;  %p1349_p9 = scmp.lt.s32.totalorder %s1343_s7, %s1343_s7 }
  0x53   :  { %p1350_p10 = por %p1349_p9, %p1348_p8 }
  0x55   :  { %p1351_p11 = pnand %p1350_p10, %p1344_p7 }
  0x57   :  { %1354 = shalt.err (!%p1351_p11)
}
  0x58   :  { %137 = dma.hbm_to_vmem [thread:$0]  %s1943_s9, 1024, %s132_s29, [#allocation18], %s1571_s20, %s1571_s20, %s1572_s21  }
  0x59   :  { %s1355_s25 = scalar_lea.hbm %s1945_s11, 1024 }
  0x5a   :  { %p1356_p12 = scmp.ne.s32.totalorder %s1945_s11, %s1355_s25  ;;  %p1359_p13 = scmp.lt.u32.totalorder %s1355_s25, %s1945_s11 }
  0x5c   :  { %p1361_p0 = pnand %p1359_p13, %p1356_p12 }
  0x5e   :  { %1364 = shalt.err (!%p1361_p0)
}
  0x5f   :  { %s1365_s3 = scalar_lea.vmem %s1731_s14, 1024  ;;  %p1370_p2 = scmp.lt.s32.totalorder %s1731_s14, %s1731_s14 }
  0x60   :  { %p1366_p1 = scmp.ne.s32.totalorder %s1731_s14, %s1365_s3  ;;  %p1371_p3 = scmp.lt.s32.totalorder %s1365_s3, %s1365_s3 }
  0x62   :  { %p1372_p4 = por %p1371_p3, %p1370_p2 }
  0x64   :  { %p1373_p5 = pnand %p1372_p4, %p1366_p1 }
  0x66   :  { %1376 = shalt.err (!%p1373_p5)
}
  0x67   :  { %159 = dma.hbm_to_vmem [thread:$0]  %s1945_s11, 1024, %s1731_s14, [#allocation21], %s1571_s20, %s1571_s20, %s1572_s21  }
  0x68   :  { %s1577_s28 = smov [#allocation2]   ;;  %s1578_s16 = smov [#allocation7]  }
  0x69   :  { %s31_s15 = sshll.u32 %s1577_s28, 4  ;;  %s56_s1 = sshll.u32 %s1578_s16, 4  ;;  %s32_s15 = int_to_ptr.vmem [resolvable:$true] %s31_s15  ;;  %s57_s1 = int_to_ptr.vmem [resolvable:$true] %s56_s1 }
  0x6a   :  { %s1377_s7 = scalar_lea.hbm %s1934_s0, 128 }
  0x6b   :  { %p1378_p6 = scmp.ne.s32.totalorder %s1934_s0, %s1377_s7  ;;  %p1381_p7 = scmp.lt.u32.totalorder %s1377_s7, %s1934_s0 }
  0x6d   :  { %p1383_p8 = pnand %p1381_p7, %p1378_p6 }
  0x6f   :  { %1386 = shalt.err (!%p1383_p8)
}
  0x70   :  { %s1387_s11 = scalar_lea.vmem %s32_s15, 128  ;;  %p1392_p10 = scmp.lt.s32.totalorder %s32_s15, %s32_s15 }
  0x71   :  { %p1388_p9 = scmp.ne.s32.totalorder %s32_s15, %s1387_s11  ;;  %p1393_p11 = scmp.lt.s32.totalorder %s1387_s11, %s1387_s11 }
  0x73   :  { %p1394_p12 = por %p1393_p11, %p1392_p10 }
  0x75   :  { %p1395_p13 = pnand %p1394_p12, %p1388_p9 }
  0x77   :  { %1398 = shalt.err (!%p1395_p13)
}
  0x78   :  { %37 = dma.hbm_to_vmem [thread:$0]  %s1934_s0, 128, %s32_s15, [#allocation3], %s1571_s20, %s1571_s20, %s1572_s21  }
  0x79   :  { %s1399_s27 = scalar_lea.hbm %s1936_s2, 16 }
  0x7a   :  { %p1400_p0 = scmp.ne.s32.totalorder %s1936_s2, %s1399_s27  ;;  %p1403_p1 = scmp.lt.u32.totalorder %s1399_s27, %s1936_s2 }
  0x7c   :  { %p1405_p2 = pnand %p1403_p1, %p1400_p0 }
  0x7e   :  { %1408 = shalt.err (!%p1405_p2)
}
  0x7f   :  { %s1409_s28 = scalar_lea.vmem %s57_s1, 16  ;;  %s1413_s16 = scalar_lea.vmem %s57_s1, 32 }
  0x80   :  { %p1410_p3 = scmp.ne.s32.totalorder %s57_s1, %s1409_s28  ;;  %p1414_p4 = scmp.lt.s32.totalorder %s57_s1, %s57_s1 }
  0x81   :  { %p1415_p5 = scmp.lt.s32.totalorder %s1413_s16, %s1409_s28 }
  0x83   :  { %p1416_p6 = por %p1415_p5, %p1414_p4 }
  0x85   :  { %p1417_p7 = pnand %p1416_p6, %p1410_p3 }
  0x87   :  { %1420 = shalt.err (!%p1417_p7)
}
  0x88   :  { %59 = dma.hbm_to_vmem [thread:$0]  %s1936_s2, 16, %s57_s1, [#allocation6]  }
  0x89   :  { %s1579_s26 = smov [#allocation10]   ;;  %s1580_s7 = smov [#allocation13]  }
  0x8a   :  { %s78_s17 = sshll.u32 %s1579_s26, 4  ;;  %s100_s22 = sshll.u32 %s1580_s7, 4  ;;  %s79_s17 = int_to_ptr.vmem [resolvable:$true] %s78_s17  ;;  %s101_s22 = int_to_ptr.vmem [resolvable:$true] %s100_s22 }
  0x8b   :  { %s1421_s24 = scalar_lea.hbm %s1938_s4, 16 }
  0x8c   :  { %p1422_p8 = scmp.ne.s32.totalorder %s1938_s4, %s1421_s24  ;;  %p1425_p9 = scmp.lt.u32.totalorder %s1421_s24, %s1938_s4 }
  0x8e   :  { %p1427_p10 = pnand %p1425_p9, %p1422_p8 }
  0x90   :  { %1430 = shalt.err (!%p1427_p10)
}
  0x91   :  { %s1431_s2 = scalar_lea.vmem %s79_s17, 16  ;;  %s1435_s1 = scalar_lea.vmem %s79_s17, 32 }
  0x92   :  { %p1432_p11 = scmp.ne.s32.totalorder %s79_s17, %s1431_s2  ;;  %p1436_p12 = scmp.lt.s32.totalorder %s79_s17, %s79_s17 }
  0x93   :  { %p1437_p13 = scmp.lt.s32.totalorder %s1435_s1, %s1431_s2 }
  0x95   :  { %p1438_p0 = por %p1437_p13, %p1436_p12 }
  0x97   :  { %p1439_p1 = pnand %p1438_p0, %p1432_p11 }
  0x99   :  { %1442 = shalt.err (!%p1439_p1)
}
  0x9a   :  { %81 = dma.hbm_to_vmem [thread:$0]  %s1938_s4, 16, %s79_s17, [#allocation9]  }
  0x9b   :  { %s1443_s9 = scalar_lea.hbm %s1940_s6, 16 }
  0x9c   :  { %p1444_p2 = scmp.ne.s32.totalorder %s1940_s6, %s1443_s9  ;;  %p1447_p3 = scmp.lt.u32.totalorder %s1443_s9, %s1940_s6 }
  0x9e   :  { %p1449_p4 = pnand %p1447_p3, %p1444_p2 }
  0xa0   :  { %1452 = shalt.err (!%p1449_p4)
}
  0xa1   :  { %s1453_s15 = scalar_lea.vmem %s101_s22, 16  ;;  %s1457_s26 = scalar_lea.vmem %s101_s22, 32 }
  0xa2   :  { %p1454_p5 = scmp.ne.s32.totalorder %s101_s22, %s1453_s15  ;;  %p1458_p6 = scmp.lt.s32.totalorder %s101_s22, %s101_s22 }
  0xa3   :  { %p1459_p7 = scmp.lt.s32.totalorder %s1457_s26, %s1453_s15 }
  0xa5   :  { %p1460_p8 = por %p1459_p7, %p1458_p6 }
  0xa7   :  { %p1461_p9 = pnand %p1460_p8, %p1454_p5 }
  0xa9   :  { %1464 = shalt.err (!%p1461_p9)
}
  0xaa   :  { %103 = dma.hbm_to_vmem [thread:$0]  %s1940_s6, 16, %s101_s22, [#allocation12]  }
  0xab   :  { %s1581_s7 = smov [#allocation16]   ;;  %s1582_s23 = smov [#allocation19]  }
  0xac   :  { %s122_s19 = sshll.u32 %s1581_s7, 4  ;;  %s144_s24 = sshll.u32 %s1582_s23, 4  ;;  %s123_s19 = int_to_ptr.vmem [resolvable:$true] %s122_s19  ;;  %s145_s24 = int_to_ptr.vmem [resolvable:$true] %s144_s24 }
  0xad   :  { %s1465_s25 = scalar_lea.hbm %s1942_s8, 16 }
  0xae   :  { %p1466_p10 = scmp.ne.s32.totalorder %s1942_s8, %s1465_s25  ;;  %p1469_p11 = scmp.lt.u32.totalorder %s1465_s25, %s1942_s8 }
  0xb0   :  { %p1471_p12 = pnand %p1469_p11, %p1466_p10 }
  0xb2   :  { %1474 = shalt.err (!%p1471_p12)
}
  0xb3   :  { %s1475_s6 = scalar_lea.vmem %s123_s19, 16  ;;  %s1479_s22 = scalar_lea.vmem %s123_s19, 32 }
  0xb4   :  { %p1476_p13 = scmp.ne.s32.totalorder %s123_s19, %s1475_s6  ;;  %p1480_p0 = scmp.lt.s32.totalorder %s123_s19, %s123_s19 }
  0xb5   :  { %p1481_p1 = scmp.lt.s32.totalorder %s1479_s22, %s1475_s6 }
  0xb7   :  { %p1482_p2 = por %p1481_p1, %p1480_p0 }
  0xb9   :  { %p1483_p3 = pnand %p1482_p2, %p1476_p13 }
  0xbb   :  { %1486 = shalt.err (!%p1483_p3)
}
  0xbc   :  { %125 = dma.hbm_to_vmem [thread:$0]  %s1942_s8, 16, %s123_s19, [#allocation15]  }
  0xbd   :  { %s1487_s29 = scalar_lea.hbm %s1944_s10, 16 }
  0xbe   :  { %p1488_p4 = scmp.ne.s32.totalorder %s1944_s10, %s1487_s29  ;;  %p1491_p5 = scmp.lt.u32.totalorder %s1487_s29, %s1944_s10 }
  0xc0   :  { %p1493_p6 = pnand %p1491_p5, %p1488_p4 }
  0xc2   :  { %1496 = shalt.err (!%p1493_p6)
}
  0xc3   :  { %s1497_s26 = scalar_lea.vmem %s145_s24, 16  ;;  %s1501_s4 = scalar_lea.vmem %s145_s24, 32 }
  0xc4   :  { %p1498_p7 = scmp.ne.s32.totalorder %s145_s24, %s1497_s26  ;;  %p1502_p8 = scmp.lt.s32.totalorder %s145_s24, %s145_s24 }
  0xc5   :  { %p1503_p9 = scmp.lt.s32.totalorder %s1501_s4, %s1497_s26 }
  0xc7   :  { %p1504_p10 = por %p1503_p9, %p1502_p8 }
  0xc9   :  { %p1505_p11 = pnand %p1504_p10, %p1498_p7 }
  0xcb   :  { %1508 = shalt.err (!%p1505_p11)
}
  0xcc   :  { %147 = dma.hbm_to_vmem [thread:$0]  %s1944_s10, 16, %s145_s24, [#allocation18]  }
  0xcd   :  { %s1583_s7 = smov [#allocation22]   ;;  %s1509_s14 = scalar_lea.hbm %s1946_s12, 16 }
  0xce   :  { %s166_s19 = sshll.u32 %s1583_s7, 4  ;;  %p1510_p12 = scmp.ne.s32.totalorder %s1946_s12, %s1509_s14  ;;  %s167_s19 = int_to_ptr.vmem [resolvable:$true] %s166_s19 }
  0xcf   :  { %p1513_p13 = scmp.lt.u32.totalorder %s1509_s14, %s1946_s12 }
  0xd1   :  { %p1515_p0 = pnand %p1513_p13, %p1510_p12 }
  0xd3   :  { %1518 = shalt.err (!%p1515_p0)
}
  0xd4   :  { %s1519_s18 = scalar_lea.vmem %s167_s19, 16  ;;  %s1523_s10 = scalar_lea.vmem %s167_s19, 32 }
  0xd5   :  { %p1520_p1 = scmp.ne.s32.totalorder %s167_s19, %s1519_s18  ;;  %p1524_p2 = scmp.lt.s32.totalorder %s167_s19, %s167_s19 }
  0xd6   :  { %p1525_p3 = scmp.lt.s32.totalorder %s1523_s10, %s1519_s18 }
  0xd8   :  { %p1526_p4 = por %p1525_p3, %p1524_p2 }
  0xda   :  { %p1527_p5 = pnand %p1526_p4, %p1520_p1 }
  0xdc   :  { %1530 = shalt.err (!%p1527_p5)
}
  0xdd   :  { %169 = dma.hbm_to_vmem [thread:$0]  %s1946_s12, 16, %s167_s19, [#allocation21]  }
  0xde   :  { %1553 = dma.done.wait [#allocation3], 128  }
  0xdf   :  { %1554 = vsyncadd [#allocation3], 4294967168 }
  0xe0   :  { %1555 = dma.done.wait [#allocation6], 1040  }
  0xe1   :  { %1556 = vsyncadd [#allocation6], 4294966256 }
  0xe2   :  { %1557 = dma.done.wait [#allocation9], 1040  }
  0xe3   :  { %1558 = vsyncadd [#allocation9], 4294966256 }
  0xe4   :  { %1559 = dma.done.wait [#allocation12], 1040  }
  0xe5   :  { %1560 = vsyncadd [#allocation12], 4294966256 }
  0xe6   :  { %1561 = dma.done.wait [#allocation15], 1040  }
  0xe7   :  { %1562 = vsyncadd [#allocation15], 4294966256 }
  0xe8   :  { %1563 = dma.done.wait [#allocation18], 1040  }
  0xe9   :  { %1564 = vsyncadd [#allocation18], 4294966256 }
  0xea   :  { %1565 = dma.done.wait [#allocation21], 1040  }
  0xeb   :  { %1566 = vsyncadd [#allocation21], 4294966256  ;;  %v1584_v0 = vmov 0.0   ;;  %vm1585_vm0 = vmmov 0   ;;  %v1196_v1 = vld [vmem:[#allocation5] sm:$0xff]   ;;  %v1197_v2 = vld [vmem:[#allocation5 + $0x8] sm:$0xff]  }
  0xec   :  { %1058 = vmatprep.subr.bf16.mxu0 %v1584_v0  ;;  %1074 = vmatprep.mubr.msk.bf16.mxu0 %vm1585_vm0, %v1584_v0  ;;  %v1198_v3 = vld [vmem:[#allocation5 + $0x10] sm:$0xff]   ;;  %v1205_v4 = vld [vmem:[#allocation8] sm:$0xff]   ;;  %v1199_v5 = vld [vmem:[#allocation5 + $0x18] sm:$0xff]   ;;  %s1586_s12 = smov [#allocation23]  }
  0xed   :  { %1078 = vmatprep.subr.bf16.mxu1 %v1584_v0  ;;  %1094 = vmatprep.mubr.msk.bf16.mxu1 %vm1585_vm0, %v1584_v0  ;;  %v1206_v6 = vld [vmem:[#allocation8 + $0x8] sm:$0xff]   ;;  %v1200_v7 = vld [vmem:[#allocation5 + $0x20] sm:$0xff]   ;;  %v1207_v8 = vld [vmem:[#allocation8 + $0x10] sm:$0xff]   ;;  %s922_s22 = sshll.u32 %s1586_s12, 4  ;;  %s923_s22 = int_to_ptr.vmem [resolvable:$true] %s922_s22 }
  0xee   :  { %1059 = vmatpush3.bf16.msra.mxu0 %v1196_v1  ;;  %1079 = vmatpush3.bf16.msra.mxu1 %v1205_v4  ;;  %v1201_v9 = vld [vmem:[#allocation5 + $0x28] sm:$0xff]   ;;  %v1208_v10 = vld [vmem:[#allocation8 + $0x18] sm:$0xff]   ;;  %v1202_v11 = vld [vmem:[#allocation5 + $0x30] sm:$0xff]   ;;  %s1531_s27 = scalar_lea.vmem %s923_s22, 128  ;;  %p1536_p7 = scmp.lt.s32.totalorder %s923_s22, %s923_s22 }
  0xef   :  { %1060 = vmatprep.subr.bf16.mxu0 %v1584_v0  ;;  %1080 = vmatprep.subr.bf16.mxu1 %v1584_v0  ;;  %v1209_v12 = vld [vmem:[#allocation8 + $0x20] sm:$0xff]   ;;  %v1203_v13 = vld [vmem:[#allocation5 + $0x38] sm:$0xff]   ;;  %v1210_v14 = vld [vmem:[#allocation8 + $0x28] sm:$0xff]   ;;  %p1532_p6 = scmp.ne.s32.totalorder %s923_s22, %s1531_s27  ;;  %p1537_p8 = scmp.lt.s32.totalorder %s1531_s27, %s1531_s27 }
  0xf0   :  { %v1204_v15 = vld [vmem:[#allocation2] sm:$0xff]   ;;  %v1213_v18 = vld [vmem:[#allocation11] sm:$0xff]   ;;  %v1214_v19 = vld [vmem:[#allocation11 + $0x8] sm:$0xff]  }
  0xf1   :  { %v1211_v16 = vld [vmem:[#allocation8 + $0x30] sm:$0xff]   ;;  %v1212_v17 = vld [vmem:[#allocation8 + $0x38] sm:$0xff]   ;;  %v1217_v22 = vld [vmem:[#allocation11 + $0x20] sm:$0xff]   ;;  %p1538_p9 = por %p1537_p8, %p1536_p7 }
  0xf2   :  { %1061 = vmatpush3.bf16.msra.mxu0 %v1197_v2  ;;  %1081 = vmatpush3.bf16.msra.mxu1 %v1206_v6  ;;  %v1215_v20 = vld [vmem:[#allocation11 + $0x10] sm:$0xff]   ;;  %v1216_v21 = vld [vmem:[#allocation11 + $0x18] sm:$0xff]   ;;  %v1218_v23 = vld [vmem:[#allocation11 + $0x28] sm:$0xff]  }
  0xf3   :  { %1062 = vmatprep.subr.bf16.mxu0 %v1584_v0  ;;  %1082 = vmatprep.subr.bf16.mxu1 %v1584_v0  ;;  %v940_v24 = vld [vmem:[#allocation7] ss:$0 sm:$0xff]  ;;  %v1219_v34 = vld [vmem:[#allocation11 + $0x30] sm:$0xff]   ;;  %v1221_v36 = vld [vmem:[#allocation14] sm:$0xff]   ;;  %p1539_p10 = pnand %p1538_p9, %p1532_p6 }
  0xf4   :  { %v1220_v35 = vld [vmem:[#allocation11 + $0x38] sm:$0xff]   ;;  %v1222_v37 = vld [vmem:[#allocation14 + $0x8] sm:$0xff]   ;;  %v1225_v40 = vld [vmem:[#allocation14 + $0x20] sm:$0xff]  }
  0xf5   :  { %v1223_v38 = vld [vmem:[#allocation14 + $0x10] sm:$0xff]   ;;  %v1224_v39 = vld [vmem:[#allocation14 + $0x18] sm:$0xff]   ;;  %v1226_v51 = vld [vmem:[#allocation14 + $0x28] sm:$0xff]  }
  0xf6   :  { %1063 = vmatpush3.bf16.msra.mxu0 %v1198_v3  ;;  %1083 = vmatpush3.bf16.msra.mxu1 %v1207_v8  ;;  %v950_v41 = vld [vmem:[#allocation10] ss:$0 sm:$0xff]  ;;  %v1227_v52 = vld [vmem:[#allocation14 + $0x30] sm:$0xff]   ;;  %v1229_v54 = vld [vmem:[#allocation17] sm:$0xff]  }
  0xf7   :  { %1064 = vmatprep.subr.bf16.mxu0 %v1584_v0  ;;  %1084 = vmatprep.subr.bf16.mxu1 %v1584_v0  ;;  %v1228_v53 = vld [vmem:[#allocation14 + $0x38] sm:$0xff]   ;;  %v1230_v55 = vld [vmem:[#allocation17 + $0x8] sm:$0xff]   ;;  %v1233_v58 = vld [vmem:[#allocation17 + $0x20] sm:$0xff]  }
  0xf8   :  { %v1231_v56 = vld [vmem:[#allocation17 + $0x10] sm:$0xff]   ;;  %v1232_v57 = vld [vmem:[#allocation17 + $0x18] sm:$0xff]   ;;  %v1234_v59 = vld [vmem:[#allocation17 + $0x28] sm:$0xff]  }
  0xf9   :  { %v959_v60 = vld [vmem:[#allocation13] ss:$0 sm:$0xff]  ;;  %v1235_v8 = vld [vmem:[#allocation17 + $0x30] sm:$0xff]  }
  0xfa   :  { %1065 = vmatpush3.bf16.msra.mxu0 %v1199_v5  ;;  %1085 = vmatpush3.bf16.msra.mxu1 %v1208_v10  ;;  %v1237_v10 = vld [vmem:[#allocation20] sm:$0xff]  }
  0xfb   :  { %1066 = vmatprep.subr.bf16.mxu0 %v1584_v0  ;;  %1086 = vmatprep.subr.bf16.mxu1 %v1584_v0 }
  0xfe   :  { %1067 = vmatpush3.bf16.msra.mxu0 %v1200_v7  ;;  %1087 = vmatpush3.bf16.msra.mxu1 %v1209_v12  ;;  %v1239_v12 = vld [vmem:[#allocation20 + $0x10] sm:$0xff]  }
  0xff   :  { %1068 = vmatprep.subr.bf16.mxu0 %v1584_v0  ;;  %1088 = vmatprep.subr.bf16.mxu1 %v1584_v0 }
 0x102   :  { %1069 = vmatpush3.bf16.msra.mxu0 %v1201_v9  ;;  %1089 = vmatpush3.bf16.msra.mxu1 %v1210_v14  ;;  %v1236_v9 = vld [vmem:[#allocation17 + $0x38] sm:$0xff]   ;;  %v1241_v14 = vld [vmem:[#allocation20 + $0x20] sm:$0xff]  }
 0x103   :  { %1070 = vmatprep.subr.bf16.mxu0 %v1584_v0  ;;  %1090 = vmatprep.subr.bf16.mxu1 %v1584_v0 }
 0x106   :  { %1071 = vmatpush3.bf16.msra.mxu0 %v1202_v11  ;;  %1091 = vmatpush3.bf16.msra.mxu1 %v1211_v16  ;;  %v1238_v11 = vld [vmem:[#allocation20 + $0x8] sm:$0xff]  }
 0x107   :  { %1072 = vmatprep.subr.bf16.mxu0 %v1584_v0  ;;  %1092 = vmatprep.subr.bf16.mxu1 %v1584_v0 }
 0x10a   :  { %1073 = vmatpush3.bf16.msra.mxu0 %v1203_v13  ;;  %1093 = vmatpush3.bf16.msra.mxu1 %v1212_v17  ;;  %v1240_v13 = vld [vmem:[#allocation20 + $0x18] sm:$0xff]  }
 0x10b   :  { %1098 = vmatprep.subr.bf16.mxu0 %v1584_v0  ;;  %1118 = vmatprep.subr.bf16.mxu1 %v1584_v0 }
 0x10d   :  { %1075 = vmatmul.mubr.bf16.vlgmr.msra.gmra.mrb[0].mxu0 %v1204_v15  ;;  %v968_v15 = vld [vmem:[#allocation16] ss:$0 sm:$0xff] }
 0x10e   :  { %1114 = vmatprep.mubr.msk.bf16.mxu0 %vm1585_vm0, %v1584_v0  ;;  %1099 = vmatpush3.bf16.msra.mxu0 %v1213_v18 }
 0x10f   :  { %1100 = vmatprep.subr.bf16.mxu0 %v1584_v0 }
 0x112   :  { %1101 = vmatpush3.bf16.msra.mxu0 %v1214_v19 }
 0x113   :  { %1102 = vmatprep.subr.bf16.mxu0 %v1584_v0 }
 0x116   :  { %1103 = vmatpush3.bf16.msra.mxu0 %v1215_v20 }
 0x117   :  { %1104 = vmatprep.subr.bf16.mxu0 %v1584_v0 }
 0x11a   :  { %1105 = vmatpush3.bf16.msra.mxu0 %v1216_v21 }
 0x11b   :  { %1106 = vmatprep.subr.bf16.mxu0 %v1584_v0 }
 0x11e   :  { %1107 = vmatpush3.bf16.msra.mxu0 %v1217_v22 }
 0x11f   :  { %1108 = vmatprep.subr.bf16.mxu0 %v1584_v0 }
 0x122   :  { %1109 = vmatpush3.bf16.msra.mxu0 %v1218_v23 }
 0x123   :  { %1110 = vmatprep.subr.bf16.mxu0 %v1584_v0 }
 0x126   :  { %1111 = vmatpush3.bf16.msra.mxu0 %v1219_v34 }
 0x127   :  { %1112 = vmatprep.subr.bf16.mxu0 %v1584_v0 }
 0x12a   :  { %1113 = vmatpush3.bf16.msra.mxu0 %v1220_v35 }
 0x12b   :  { %1138 = vmatprep.subr.bf16.mxu0 %v1584_v0 }
 0x1e0   :  { %v323_v25 = vpop.f32.mrb[0].mxu0 }
 0x1e1   :  { %v324_v26 = vadd.f32 %v940_v24, %v323_v25  ;;  %v1076_v27 = vpop.f32.mrb[1].mxu0  ;;  %v1242_v25 = vld [vmem:[#allocation20 + $0x28] sm:$0xff]  }
 0x1e2   :  { %v326_v28 = vpop.f32.mrb[2].mxu0  ;;  %v1244_v27 = vld [vmem:[#allocation20 + $0x38] sm:$0xff]  }
 0x1e3   :  { %v327_v29 = vadd.f32 %v940_v24, %v326_v28  ;;  %v1077_v30 = vpop.f32.mrb[3].mxu0  ;;  %v330_v31 = vmax.f32 %v324_v26, 0.0  ;;  %v1243_v26 = vld [vmem:[#allocation20 + $0x30] sm:$0xff]   ;;  %v977_v28 = vld [vmem:[#allocation19] ss:$0 sm:$0xff] }
 0x1e5   :  { %v331_v32 = vmax.f32 %v327_v29, 0.0 }
 0x1e7   :  { %v1885_v33 = vpack.c.bf16 %v331_v32, %v330_v31 }
 0x1e9   :  { %1095 = vmatmul.mubr.bf16.vlgmr.msra.gmra.mrb[0].mxu1 %v1885_v33 }
 0x1ea   :  { %1134 = vmatprep.mubr.msk.bf16.mxu1 %vm1585_vm0, %v1584_v0  ;;  %1119 = vmatpush3.bf16.msra.mxu1 %v1221_v36 }
 0x1eb   :  { %1120 = vmatprep.subr.bf16.mxu1 %v1584_v0 }
 0x1ee   :  { %1121 = vmatpush3.bf16.msra.mxu1 %v1222_v37 }
 0x1ef   :  { %1122 = vmatprep.subr.bf16.mxu1 %v1584_v0 }
 0x1f2   :  { %1123 = vmatpush3.bf16.msra.mxu1 %v1223_v38 }
 0x1f3   :  { %1124 = vmatprep.subr.bf16.mxu1 %v1584_v0 }
 0x1f6   :  { %1125 = vmatpush3.bf16.msra.mxu1 %v1224_v39  ;;  %v986_v39 = vld [vmem:[#allocation22] ss:$0 sm:$0xff] }
 0x1f7   :  { %1126 = vmatprep.subr.bf16.mxu1 %v1584_v0 }
 0x1fa   :  { %1127 = vmatpush3.bf16.msra.mxu1 %v1225_v40 }
 0x1fb   :  { %1128 = vmatprep.subr.bf16.mxu1 %v1584_v0 }
 0x1fe   :  { %1129 = vmatpush3.bf16.msra.mxu1 %v1226_v51 }
 0x1ff   :  { %1130 = vmatprep.subr.bf16.mxu1 %v1584_v0 }
 0x202   :  { %1131 = vmatpush3.bf16.msra.mxu1 %v1227_v52 }
 0x203   :  { %1132 = vmatprep.subr.bf16.mxu1 %v1584_v0 }
 0x206   :  { %1133 = vmatpush3.bf16.msra.mxu1 %v1228_v53 }
 0x207   :  { %1158 = vmatprep.subr.bf16.mxu1 %v1584_v0 }
 0x2bc   :  { %v438_v42 = vpop.f32.mrb[0].mxu1 }
 0x2bd   :  { %v439_v43 = vadd.f32 %v950_v41, %v438_v42  ;;  %v1096_v44 = vpop.f32.mrb[1].mxu1 }
 0x2be   :  { %v441_v45 = vpop.f32.mrb[2].mxu1 }
 0x2bf   :  { %v442_v46 = vadd.f32 %v950_v41, %v441_v45  ;;  %v1097_v47 = vpop.f32.mrb[3].mxu1  ;;  %v445_v48 = vmax.f32 %v439_v43, 0.0 }
 0x2c1   :  { %v446_v49 = vmax.f32 %v442_v46, 0.0 }
 0x2c3   :  { %v447_v50 = vpack.c.bf16 %v446_v49, %v445_v48 }
 0x2c5   :  { %1115 = vmatmul.mubr.bf16.vlgmr.msra.gmra.mrb[4].mxu0 %v447_v50 }
 0x2c6   :  { %1154 = vmatprep.mubr.msk.bf16.mxu0 %vm1585_vm0, %v1584_v0  ;;  %1139 = vmatpush3.bf16.msra.mxu0 %v1229_v54 }
 0x2c7   :  { %1140 = vmatprep.subr.bf16.mxu0 %v1584_v0 }
 0x2ca   :  { %1141 = vmatpush3.bf16.msra.mxu0 %v1230_v55 }
 0x2cb   :  { %1142 = vmatprep.subr.bf16.mxu0 %v1584_v0 }
 0x2ce   :  { %1143 = vmatpush3.bf16.msra.mxu0 %v1231_v56 }
 0x2cf   :  { %1144 = vmatprep.subr.bf16.mxu0 %v1584_v0 }
 0x2d2   :  { %1145 = vmatpush3.bf16.msra.mxu0 %v1232_v57 }
 0x2d3   :  { %1146 = vmatprep.subr.bf16.mxu0 %v1584_v0 }
 0x2d6   :  { %1147 = vmatpush3.bf16.msra.mxu0 %v1233_v58 }
 0x2d7   :  { %1148 = vmatprep.subr.bf16.mxu0 %v1584_v0 }
 0x2da   :  { %1149 = vmatpush3.bf16.msra.mxu0 %v1234_v59 }
 0x2db   :  { %1150 = vmatprep.subr.bf16.mxu0 %v1584_v0 }
 0x2de   :  { %1151 = vmatpush3.bf16.msra.mxu0 %v1235_v8 }
 0x2df   :  { %1152 = vmatprep.subr.bf16.mxu0 %v1584_v0 }
 0x2e2   :  { %1153 = vmatpush3.bf16.msra.mxu0 %v1236_v9 }
 0x398   :  { %v553_v61 = vpop.f32.mrb[4].mxu0 }
 0x399   :  { %v554_v62 = vadd.f32 %v959_v60, %v553_v61  ;;  %v1116_v63 = vpop.f32.mrb[5].mxu0 }
 0x39a   :  { %v556_v1 = vpop.f32.mrb[6].mxu0 }
 0x39b   :  { %v557_v2 = vadd.f32 %v959_v60, %v556_v1  ;;  %v1117_v3 = vpop.f32.mrb[7].mxu0  ;;  %v560_v4 = vmax.f32 %v554_v62, 0.0 }
 0x39d   :  { %v561_v5 = vmax.f32 %v557_v2, 0.0 }
 0x39f   :  { %v562_v6 = vpack.c.bf16 %v561_v5, %v560_v4 }
 0x3a1   :  { %v563_v7 = vadd.bf16 %v562_v6, %v1885_v33 }
 0x3a3   :  { %1135 = vmatmul.mubr.bf16.vlgmr.msra.gmra.mrb[4].mxu1 %v563_v7 }
 0x3a4   :  { %1174 = vmatprep.mubr.msk.bf16.mxu1 %vm1585_vm0, %v1584_v0  ;;  %1159 = vmatpush3.bf16.msra.mxu1 %v1237_v10 }
 0x3a5   :  { %1160 = vmatprep.subr.bf16.mxu1 %v1584_v0 }
 0x3a8   :  { %1161 = vmatpush3.bf16.msra.mxu1 %v1238_v11 }
 0x3a9   :  { %1162 = vmatprep.subr.bf16.mxu1 %v1584_v0 }
 0x3ac   :  { %1163 = vmatpush3.bf16.msra.mxu1 %v1239_v12 }
 0x3ad   :  { %1164 = vmatprep.subr.bf16.mxu1 %v1584_v0 }
 0x3b0   :  { %1165 = vmatpush3.bf16.msra.mxu1 %v1240_v13 }
 0x3b1   :  { %1166 = vmatprep.subr.bf16.mxu1 %v1584_v0 }
 0x3b4   :  { %1167 = vmatpush3.bf16.msra.mxu1 %v1241_v14 }
 0x3b5   :  { %1168 = vmatprep.subr.bf16.mxu1 %v1584_v0 }
 0x3b8   :  { %1169 = vmatpush3.bf16.msra.mxu1 %v1242_v25 }
 0x3b9   :  { %1170 = vmatprep.subr.bf16.mxu1 %v1584_v0 }
 0x3bc   :  { %1171 = vmatpush3.bf16.msra.mxu1 %v1243_v26 }
 0x3bd   :  { %1172 = vmatprep.subr.bf16.mxu1 %v1584_v0 }
 0x3c0   :  { %1173 = vmatpush3.bf16.msra.mxu1 %v1244_v27 }
 0x476   :  { %v669_v16 = vpop.f32.mrb[4].mxu1 }
 0x477   :  { %v670_v17 = vadd.f32 %v968_v15, %v669_v16  ;;  %v1136_v18 = vpop.f32.mrb[5].mxu1 }
 0x478   :  { %v672_v19 = vpop.f32.mrb[6].mxu1 }
 0x479   :  { %v673_v20 = vadd.f32 %v968_v15, %v672_v19  ;;  %v1137_v21 = vpop.f32.mrb[7].mxu1  ;;  %v676_v22 = vmax.f32 %v670_v17, 0.0 }
 0x47b   :  { %v677_v23 = vmax.f32 %v673_v20, 0.0 }
 0x47d   :  { %v678_v24 = vpack.c.bf16 %v677_v23, %v676_v22 }
 0x47f   :  { %1155 = vmatmul.mubr.bf16.vlgmr.msra.gmra.mrb[8].mxu0 %v678_v24 }
 0x552   :  { %v784_v29 = vpop.f32.mrb[8].mxu0 }
 0x553   :  { %v785_v30 = vadd.f32 %v977_v28, %v784_v29  ;;  %v1156_v31 = vpop.f32.mrb[9].mxu0 }
 0x554   :  { %v787_v32 = vpop.f32.mrb[10].mxu0 }
 0x555   :  { %v788_v33 = vadd.f32 %v977_v28, %v787_v32  ;;  %v1157_v34 = vpop.f32.mrb[11].mxu0  ;;  %v791_v35 = vmax.f32 %v785_v30, 0.0 }
 0x557   :  { %v792_v36 = vmax.f32 %v788_v33, 0.0 }
 0x559   :  { %v793_v37 = vpack.c.bf16 %v792_v36, %v791_v35 }
 0x55b   :  { %v794_v38 = vadd.bf16 %v793_v37, %v563_v7 }
 0x55d   :  { %1175 = vmatmul.mubr.bf16.vlgmr.msra.gmra.mrb[8].mxu1 %v794_v38 }
 0x630   :  { %v900_v40 = vpop.f32.mrb[8].mxu1 }
 0x631   :  { %v1176_v41 = vpop.f32.mrb[9].mxu1  ;;  %v901_v0 = vadd.f32 %v986_v39, %v900_v40 }
 0x632   :  { %v903_v42 = vpop.f32.mrb[10].mxu1 }
 0x633   :  { %v904_v43 = vadd.f32 %v986_v39, %v903_v42  ;;  %v1177_v44 = vpop.f32.mrb[11].mxu1 }
 0x635   :  { %v1002_v45 = vpack.c.bf16 %v904_v43, %v901_v0 }
 0x637   :  { %1003 = vst [vmem:[#allocation23] sm:$0xff] %v1002_v45  }
 0x638   :  { %1542 = shalt.err (!%p1539_p10)
}
 0x639   :  { %s1543_s9 = scalar_lea.hbm %s1947_s13, 128 }
 0x63a   :  { %p1544_p11 = scmp.ne.s32.totalorder %s1947_s13, %s1543_s9  ;;  %p1547_p12 = scmp.lt.u32.totalorder %s1543_s9, %s1947_s13 }
 0x63c   :  { %p1549_p13 = pnand %p1547_p12, %p1544_p11 }
 0x63e   :  { %1552 = shalt.err (!%p1549_p13)
}
 0x63f   :  { %928 = dma.vmem_to_hbm [thread:$0]  %s923_s22, 128, %s1947_s13, [#allocation4], %s1571_s20, %s1571_s20, %s1572_s21  }
 0x640   :  { %1567 = dma.done.wait [#allocation4], 128  }
 0x641   :  { %1568 = vsyncadd [#allocation4], 4294967168 }
 0x642   :  { %932 = vsyncpa [#allocation3], 1 }
 0x643   :  { %933 = vsyncpa [#allocation6], 1 }
 0x644   :  { %934 = vsyncpa [#allocation9], 1 }
 0x645   :  { %935 = vsyncpa [#allocation12], 1 }
 0x646   :  { %936 = vsyncpa [#allocation15], 1 }
 0x647   :  { %937 = vsyncpa [#allocation18], 1 }
 0x648   :  { %938 = vsyncpa [#allocation21], 1 }
 0x649   :  { %939 = vsyncpa [#allocation4], 1 }

</bundles_post_ra>
